<compile_context>
chip_gen: v7x
topology: tpu7x:2x2x1
jax: 0.10.0
libtpu: 0.0.40
codegen_flags: <defaults>
</compile_context>

<pallas_src>
import functools

import jax
import jax.numpy as jnp
from jax import lax
from jax.experimental import pallas as pl
from jax.experimental.pallas import tpu as pltpu


# ----------------------------------------------------------------------------
# Pallas kernel: fused FSUIE_proj (y = x @ W + b) + embedding gather + concat.
# Grid = (batch, row_tile).  Each step owns one (t_rows, H) slab of the
# (Q+L, H) per-batch output: tile 0 holds the Q projection rows followed by
# the first embedding rows; later tiles are pure embedding gathers.
# ----------------------------------------------------------------------------
def _proj_concat_gather_kernel(ids_ref,    # (B, L) int32  scalar-prefetch (SMEM)
                               x_ref,      # (Q, K) f32    FSUIE_inputs, this batch
                               w_ref,      # (K, H) f32    FSUIE_proj weight (resident)
                               b_ref,      # (1, H) f32    FSUIE_proj bias   (resident)
                               emb_hbm,    # (V, H) f32    word-embedding table, HBM
                               o_ref,      # (t_rows, H)   output row tile (VMEM)
                               sem,        # (1,) DMA semaphore
                               *, q_len, t_rows):
    bi = pl.program_id(0)
    ti = pl.program_id(1)
    row0 = ti * t_rows                      # first global output row of this tile

    # ---- 1) gather: one HBM->VMEM row DMA per output row, written straight
    #         into the pipelined output block.  Projection rows (tile 0 only)
    #         use a clamped token position; they are overwritten by the matmul
    #         store below, which runs only after all waits have completed.
    def _start(r, carry):
        pos = jnp.maximum(row0 + r - q_len, 0)          # token position in [0, L)
        tok = ids_ref[bi, pos]
        pltpu.make_async_copy(emb_hbm.at[pl.ds(tok, 1), :],
                              o_ref.at[pl.ds(r, 1), :],
                              sem.at[0]).start()
        return carry
    lax.fori_loop(0, t_rows, _start, 0)

    def _wait(r, carry):
        pltpu.make_async_copy(emb_hbm.at[pl.ds(0, 1), :],   # dummy src (shape only)
                              o_ref.at[pl.ds(r, 1), :],
                              sem.at[0]).wait()
        return carry
    lax.fori_loop(0, t_rows, _wait, 0)

    # ---- 2) FSUIE_proj rows (first tile of each batch element only).
    #         f32 operands, f32 accumulation; the matmul is a negligible part
    #         of this mem-bound kernel, so MXU occupancy is not on the
    #         critical path even at Q=8..32.
    @pl.when(ti == 0)
    def _():
        acc = jnp.dot(x_ref[...], w_ref[...], preferred_element_type=jnp.float32)
        o_ref[:q_len, :] = (acc + b_ref[...]).astype(o_ref.dtype)


def _pick_row_tile(total_rows, q_len, max_tile=512):
    """Largest multiple of 8 that divides total_rows, is <= max_tile, >= q_len."""
    best = None
    for d in range(8, min(total_rows, max_tile) + 1, 8):
        if total_rows % d == 0 and d >= q_len:
            best = d
    if best is None:
        raise ValueError(
            "no valid row tile; pad L so (Q + L) has a multiple-of-8 divisor >= Q"
        )
    return best


def fused_proj_concat_gather(x, w, b, input_ids, embed_table, *, row_tile=None):
    """Returns concat([x @ w + b, embed_table[input_ids]], axis=1), (B, Q+L, H).

    x:           (B, Q, K) f32   FSUIE_inputs (PQformer query outputs)
    w:           (K, H)    f32   FSUIE_proj weight, stored (in_dim, out_dim)
    b:           (H,)      f32   FSUIE_proj bias
    input_ids:   (B, L)    int   IE text token ids
    embed_table: (V, H)    f32   word-embedding table (stays in HBM)
    """
    B, Q, K = x.shape
    _, L = input_ids.shape
    V, H = embed_table.shape
    assert w.shape == (K, H) and b.shape == (H,)
    # Lane-dense output (full `vst` stores) requires H % 128 == 0 — true for
    # real BERT-family hidden sizes (768 / 1024 / ...).
    assert H % 128 == 0, "text hidden size must be a multiple of 128"
    assert Q % 8 == 0, "number of query tokens must be a multiple of 8"

    total = Q + L
    t_rows = _pick_row_tile(total, Q) if row_tile is None else row_tile
    assert total % t_rows == 0 and t_rows % 8 == 0 and Q <= t_rows, (
        "row tile must be a multiple of 8, >= Q, and divide Q + L "
        "(pad L if needed)"
    )
    nt = total // t_rows

    b2 = b.reshape(1, H).astype(jnp.float32)
    ids = input_ids.astype(jnp.int32)

    kernel = functools.partial(_proj_concat_gather_kernel, q_len=Q, t_rows=t_rows)
    grid_spec = pltpu.PrefetchScalarGridSpec(
        num_scalar_prefetch=1,                       # input_ids -> SMEM
        grid=(B, nt),
        in_specs=[
            pl.BlockSpec((None, Q, K), lambda bi, ti, ids_s: (bi, 0, 0)),  # x
            pl.BlockSpec((K, H), lambda bi, ti, ids_s: (0, 0)),            # W (resident)
            pl.BlockSpec((1, H), lambda bi, ti, ids_s: (0, 0)),            # bias
            pl.BlockSpec(memory_space=pl.ANY),                             # embed table (HBM)
        ],
        out_specs=pl.BlockSpec((None, t_rows, H), lambda bi, ti, ids_s: (bi, ti, 0)),
        scratch_shapes=[pltpu.SemaphoreType.DMA((1,))],
    )
    return pl.pallas_call(
        kernel,
        out_shape=jax.ShapeDtypeStruct((B, total, H), jnp.float32),
        grid_spec=grid_spec,
        compiler_params=pltpu.CompilerParams(
            # Disjoint output blocks per (batch, row-tile) step: both axes are
            # parallel so v7x's two TensorCores both stay busy even at B=2.
            dimension_semantics=("parallel", "parallel"),
        ),
    )(ids, x, w, b2, embed_table)


# ----------------------------------------------------------------------------
# DQPSA forward (glue around the fused kernel).
# ----------------------------------------------------------------------------
def dqpsa_forward(samples, params, loss_weights, row_tile=None):
    # --- stand-in for PQformer_outputs = self.pdq(samples) ------------------
    fsuie_inputs = samples["FSUIE_inputs"]          # (B, Q, Qformer_hidden)
    loss_itc = samples["loss_itc"]                   # scalar
    loss_itm = samples["loss_itm"]                   # scalar
    B, Q, _ = fsuie_inputs.shape

    text_input_ids = samples["IE_inputs"]["input_ids"]         # (B, L)
    text_att_mask = samples["IE_inputs"]["attention_mask"]     # (B, L)

    # --- FSUIE_proj + dropout(eval = identity) + embedding gather + concat,
    #     all fused into a single Pallas kernel (no (B, L, H) intermediate).
    # TODO(synk): only the word-embedding lookup of the external encoder's
    # embeddings() is reproduced; position/token-type embeddings + LayerNorm
    # belong to the pretrained Text_encoder_with_epe.
    text_inputs_embeds = fused_proj_concat_gather(
        fsuie_inputs, params["proj_w"], params["proj_b"],
        text_input_ids, params["embed_table"], row_tile=row_tile,
    )                                                # (B, Q+L, text_hidden)
    query_outputs = text_inputs_embeds[:, :Q, :]     # FSUIE_proj output rows

    # --- attention-mask construction ----------------------------------------
    text_attn = jnp.ones((B, Q), dtype=jnp.int32)    # torch.ones(..., long)
    text_encoder_atts = jnp.concatenate([text_attn, text_att_mask], axis=1)

    # TODO(synk): FSUIE_outputs = self.text_encoder(inputs_embeds=...,
    # attention_mask=..., start/end_positions=..., prompt_mask=...) is an
    # external pretrained encoder; its loss_epe is taken as a synthetic input.
    loss_epe = samples["loss_epe"]

    total_loss = (loss_weights["itc"] * loss_itc
                  + loss_weights["itm"] * loss_itm
                  + loss_weights["epe"] * loss_epe)

    return {
        "total_loss": total_loss,
        "loss_epe": loss_epe,
        "loss_itm": loss_itm,
        "loss_itc": loss_itc,
        "query_outputs": query_outputs,
        "text_inputs_embeds": text_inputs_embeds,
        "text_encoder_atts": text_encoder_atts,
    }


# ----------------------------------------------------------------------------
# Main: deterministic small-shape smoke test.
# ----------------------------------------------------------------------------
if __name__ == "__main__":
    key = jax.random.PRNGKey(0)
    k1, k2, k3, k4, k5 = jax.random.split(key, 5)

    # Small config consistent with the module.  TXT_HID is a multiple of 128
    # (lane-dense output).  Q + L = 64 with a row tile of 32 exercises both
    # the mixed projection+gather tile and the pure-gather tile.
    B = 2                    # batch
    Q = 8                    # number of PQformer query tokens
    L = 56                   # IE text sequence length
    QF_HID = 32              # MFSUIE_config['pdq']['hidden_size']
    TXT_HID = 128            # MFSUIE_config['text_model']['hidden_size']
    VOCAB = 100
    ROW_TILE = 32

    loss_weights = {"itc": 1.0, "itm": 1.0, "epe": 0.5}

    # Deterministic parameters (nn.Linear(QF_HID, TXT_HID); weight stored
    # (in_dim, out_dim) so the kernel computes y = x @ W + b directly).
    params = {
        "proj_w": jax.random.normal(k1, (QF_HID, TXT_HID), jnp.float32) * 0.02,
        "proj_b": jax.random.normal(k2, (TXT_HID,), jnp.float32) * 0.02,
        "embed_table": jax.random.normal(k3, (VOCAB, TXT_HID), jnp.float32) * 0.02,
    }

    samples = {
        "FSUIE_inputs": jax.random.normal(k4, (B, Q, QF_HID), jnp.float32),
        "loss_itc": jnp.float32(0.31),
        "loss_itm": jnp.float32(0.47),
        "loss_epe": jnp.float32(0.83),
        "IE_inputs": {
            "input_ids": jax.random.randint(k5, (B, L), 0, VOCAB, jnp.int32),
            "attention_mask": jnp.ones((B, L), jnp.int32),
        },
    }

    out = dqpsa_forward(samples, params, loss_weights, row_tile=ROW_TILE)
    out = jax.tree_util.tree_map(jax.block_until_ready, out)

    # --- correctness checks against plain-JAX references --------------------
    # 1) FSUIE_proj rows (f32 operands, f32 accumulation in both paths).
    ref_q = (jnp.dot(samples["FSUIE_inputs"].reshape(B * Q, QF_HID),
                     params["proj_w"],
                     preferred_element_type=jnp.float32)
             + params["proj_b"]).reshape(B, Q, TXT_HID)
    assert jnp.allclose(out["query_outputs"], ref_q, atol=1e-2, rtol=1e-2)

    # 2) embedding rows of the fused output are a pure gather of the table.
    ref_emb = jnp.take(params["embed_table"],
                       samples["IE_inputs"]["input_ids"], axis=0)
    assert jnp.allclose(out["text_inputs_embeds"][:, Q:, :], ref_emb,
                        atol=1e-6, rtol=1e-6)

    # 3) loss combination and glue shapes.
    expected_loss = (loss_weights["itc"] * 0.31
                     + loss_weights["itm"] * 0.47
                     + loss_weights["epe"] * 0.83)
    assert jnp.allclose(out["total_loss"], expected_loss, atol=1e-6)
    assert out["text_inputs_embeds"].shape == (B, Q + L, TXT_HID)
    assert out["text_encoder_atts"].shape == (B, Q + L)

    print("KERNEL_OK")
</pallas_src>

<mosaic_0001>
module attributes {stable_mosaic.version = 11 : i64} {
  func.func @_proj_concat_gather_kernel(%arg0: i32, %arg1: i32, %arg2: memref<2x56xi32, #tpu.memory_space<smem>>, %arg3: memref<1x8x32xf32, #tpu.memory_space<vmem>>, %arg4: memref<32x128xf32, #tpu.memory_space<vmem>>, %arg5: memref<1x128xf32, #tpu.memory_space<vmem>>, %arg6: memref<100x128xf32, #tpu.memory_space<any>>, %arg7: memref<1x32x128xf32, #tpu.memory_space<vmem>>, %arg8: memref<1x!tpu.dma_semaphore, #tpu.memory_space<semaphore_mem>>) attributes {dimension_semantics = [#tpu.dimension_semantics<parallel>, #tpu.dimension_semantics<parallel>], iteration_bounds = array<i64: 2, 2>, scalar_prefetch = 1 : i64, scratch_operands = 1 : i64, tpu.core_type = #tpu.core_type<tc>, window_params = [{transform_indices = @transform_0, window_bounds = array<i64: 1, 8, 32>}, {pipeline_mode = #tpu.pipeline_mode<synchronous>, transform_indices = @transform_1, window_bounds = array<i64: 32, 128>}, {pipeline_mode = #tpu.pipeline_mode<synchronous>, transform_indices = @transform_2, window_bounds = array<i64: 1, 128>}, {}, {transform_indices = @transform_4, window_bounds = array<i64: 1, 32, 128>}]} {
    %c32_i32 = arith.constant 32 : i32
    %0 = arith.muli %arg1, %c32_i32 : i32
    %c0_i32 = arith.constant 0 : i32
    %c32_i32_0 = arith.constant 32 : i32
    %1 = arith.addi %c0_i32, %c32_i32_0 : i32
    %c1_i32 = arith.constant 1 : i32
    scf.for %arg9 = %c0_i32 to %1 step %c1_i32  : i32 {
      %6 = arith.addi %0, %arg9 : i32
      %c8_i32 = arith.constant 8 : i32
      %7 = arith.subi %6, %c8_i32 : i32
      %c0_i32_8 = arith.constant 0 : i32
      %8 = arith.maxsi %7, %c0_i32_8 : i32
      %9 = arith.index_cast %arg0 : i32 to index
      %10 = arith.index_cast %8 : i32 to index
      %11 = memref.load %arg2[%9, %10] : memref<2x56xi32, #tpu.memory_space<smem>>
      %c0_i32_9 = arith.constant 0 : i32
      %c0_i32_10 = arith.constant 0 : i32
      %12 = tpu.memref_slice %arg6[%11, %c0_i32_10] : memref<100x128xf32, #tpu.memory_space<any>> -> memref<1x128xf32, #tpu.memory_space<any>>
      %c0_i32_11 = arith.constant 0 : i32
      %c0_i32_12 = arith.constant 0 : i32
      %13 = tpu.memref_slice %arg7[%c0_i32_11, %arg9, %c0_i32_12] : memref<1x32x128xf32, #tpu.memory_space<vmem>> -> memref<1x1x128xf32, #tpu.memory_space<vmem>>
      %14 = tpu.memref_squeeze %13 : memref<1x1x128xf32, #tpu.memory_space<vmem>> -> memref<1x128xf32, #tpu.memory_space<vmem>>
      %15 = tpu.memref_slice %arg8[%c0_i32_9] : memref<1x!tpu.dma_semaphore, #tpu.memory_space<semaphore_mem>> -> memref<1x!tpu.dma_semaphore, #tpu.memory_space<semaphore_mem>>
      %16 = tpu.memref_squeeze %15 : memref<1x!tpu.dma_semaphore, #tpu.memory_space<semaphore_mem>> -> memref<!tpu.dma_semaphore, #tpu.memory_space<semaphore_mem>>
      tpu.enqueue_dma source(%12 : memref<1x128xf32, #tpu.memory_space<any>>) target(%14 : memref<1x128xf32, #tpu.memory_space<vmem>>) target_semaphore(%16 : memref<!tpu.dma_semaphore, #tpu.memory_space<semaphore_mem>>)
    }
    %c32_i32_1 = arith.constant 32 : i32
    %c0_i32_2 = arith.constant 0 : i32
    %c32_i32_3 = arith.constant 32 : i32
    %2 = arith.addi %c0_i32_2, %c32_i32_3 : i32
    %c1_i32_4 = arith.constant 1 : i32
    scf.for %arg9 = %c0_i32_2 to %2 step %c1_i32_4  : i32 {
      %c0_i32_8 = arith.constant 0 : i32
      %c0_i32_9 = arith.constant 0 : i32
      %c0_i32_10 = arith.constant 0 : i32
      %6 = tpu.memref_slice %arg6[%c0_i32_9, %c0_i32_10] : memref<100x128xf32, #tpu.memory_space<any>> -> memref<1x128xf32, #tpu.memory_space<any>>
      %c0_i32_11 = arith.constant 0 : i32
      %c0_i32_12 = arith.constant 0 : i32
      %7 = tpu.memref_slice %arg7[%c0_i32_11, %arg9, %c0_i32_12] : memref<1x32x128xf32, #tpu.memory_space<vmem>> -> memref<1x1x128xf32, #tpu.memory_space<vmem>>
      %8 = tpu.memref_squeeze %7 : memref<1x1x128xf32, #tpu.memory_space<vmem>> -> memref<1x128xf32, #tpu.memory_space<vmem>>
      %9 = tpu.memref_slice %arg8[%c0_i32_8] : memref<1x!tpu.dma_semaphore, #tpu.memory_space<semaphore_mem>> -> memref<1x!tpu.dma_semaphore, #tpu.memory_space<semaphore_mem>>
      %10 = tpu.memref_squeeze %9 : memref<1x!tpu.dma_semaphore, #tpu.memory_space<semaphore_mem>> -> memref<!tpu.dma_semaphore, #tpu.memory_space<semaphore_mem>>
      tpu.wait_dma2 semaphore(%10 : memref<!tpu.dma_semaphore, #tpu.memory_space<semaphore_mem>>) src(%6 : memref<1x128xf32, #tpu.memory_space<any>>) dst(%8 : memref<1x128xf32, #tpu.memory_space<vmem>>)
    }
    %c32_i32_5 = arith.constant 32 : i32
    %c0_i32_6 = arith.constant 0 : i32
    %3 = arith.cmpi eq, %arg1, %c0_i32_6 : i32
    %4 = arith.extui %3 : i1 to i32
    %c0_i32_7 = arith.constant 0 : i32
    %5 = arith.cmpi ne, %4, %c0_i32_7 : i32
    scf.if %5 {
      %c0 = arith.constant 0 : index
      %c0_8 = arith.constant 0 : index
      %c0_9 = arith.constant 0 : index
      %6 = vector.load %arg3[%c0, %c0_8, %c0_9] : memref<1x8x32xf32, #tpu.memory_space<vmem>>, vector<1x8x32xf32>
      %7 = vector.shape_cast %6 : vector<1x8x32xf32> to vector<8x32xf32>
      %c0_10 = arith.constant 0 : index
      %c0_11 = arith.constant 0 : index
      %8 = vector.load %arg4[%c0_10, %c0_11] : memref<32x128xf32, #tpu.memory_space<vmem>>, vector<32x128xf32>
      %cst = arith.constant dense<0.000000e+00> : vector<8x128xf32>
      %9 = tpu.matmul %7, %8, %cst {dimension_numbers = #tpu.dot_dimension_numbers<[1], [0], [0], [1], [0, 0, 1, 1], [], []>} : vector<8x32xf32>, vector<32x128xf32>, vector<8x128xf32> -> vector<8x128xf32>
      %c0_12 = arith.constant 0 : index
      %c0_13 = arith.constant 0 : index
      %10 = vector.load %arg5[%c0_12, %c0_13] : memref<1x128xf32, #tpu.memory_space<vmem>>, vector<1x128xf32>
      %11 = vector.broadcast %10 : vector<1x128xf32> to vector<8x128xf32>
      %12 = arith.addf %9, %11 : vector<8x128xf32>
      %c0_14 = arith.constant 0 : index
      %c0_15 = arith.constant 0 : index
      %c0_16 = arith.constant 0 : index
      %13 = vector.load %arg7[%c0_14, %c0_15, %c0_16] : memref<1x32x128xf32, #tpu.memory_space<vmem>>, vector<1x8x128xf32>
      %14 = vector.shape_cast %13 : vector<1x8x128xf32> to vector<8x128xf32>
      %15 = vector.shape_cast %12 : vector<8x128xf32> to vector<1x8x128xf32>
      tpu.vector_store %arg7[%c0_14, %c0_15, %c0_16], %15 {strides = array<i32>} : memref<1x32x128xf32, #tpu.memory_space<vmem>>, vector<1x8x128xf32>,
    } else {
    }
    return
  }
  func.func @transform_0(%arg0: i32, %arg1: i32, %arg2: memref<2x56xi32, #tpu.memory_space<smem>>) -> (i32, i32, i32) {
    %c0_i32 = arith.constant 0 : i32
    %c0_i32_0 = arith.constant 0 : i32
    %c0_i32_1 = arith.constant 0 : i32
    return %arg0, %c0_i32, %c0_i32_0 : i32, i32, i32
  }
  func.func @transform_1(%arg0: i32, %arg1: i32, %arg2: memref<2x56xi32, #tpu.memory_space<smem>>) -> (i32, i32) {
    %c0_i32 = arith.constant 0 : i32
    %c0_i32_0 = arith.constant 0 : i32
    %c0_i32_1 = arith.constant 0 : i32
    return %c0_i32, %c0_i32_0 : i32, i32
  }
  func.func @transform_2(%arg0: i32, %arg1: i32, %arg2: memref<2x56xi32, #tpu.memory_space<smem>>) -> (i32, i32) {
    %c0_i32 = arith.constant 0 : i32
    %c0_i32_0 = arith.constant 0 : i32
    %c0_i32_1 = arith.constant 0 : i32
    return %c0_i32, %c0_i32_0 : i32, i32
  }
  func.func @transform_4(%arg0: i32, %arg1: i32, %arg2: memref<2x56xi32, #tpu.memory_space<smem>>) -> (i32, i32, i32) {
    %c0_i32 = arith.constant 0 : i32
    %c0_i32_0 = arith.constant 0 : i32
    return %arg0, %arg1, %c0_i32 : i32, i32, i32
  }
}

</mosaic_0001>

<bundles_post_ra>
// kernel: tpu_custom_call.1
= control target key start
LH: loop header
LB: loop body
LE: loop exit
PB: predicated region body
PF: predicated region fallthrough
CT: control target
= control target key end

     0   :  { %s1270_s0 = inlined_call_operand.hbm [shape: s32[2,56], index: 0, kind: input, shape index: {}]   ;;  %s1271_s1 = inlined_call_operand.hbm [shape: f32[2,8,32], index: 1, kind: input, shape index: {}]   ;;  %s1272_s2 = inlined_call_operand.hbm [shape: f32[32,128], index: 2, kind: input, shape index: {}]   ;;  %s1273_s3 = inlined_call_operand.vmem [shape: f32[1,128], index: 3, kind: input, shape index: {}]   ;;  %s1274_s4 = inlined_call_operand.hbm [shape: f32[100,128], index: 4, kind: input, shape index: {}]   ;;  %s1275_s5 = inlined_call_operand.hbm [shape: f32[2,64,128], index: 5, kind: output, shape index: {}]  }
   0x1   :  { %1291 = sst [smem:[#allocation28_spill]] %s1271_s1  ;;  %s671_s20 = scalar_lea.hbm %s1270_s0, 32 }
   0x2   :  { %1292 = sst [smem:[#allocation29_spill]] %s1272_s2  ;;  %p672_p0 = scmp.ne.s32.totalorder %s1270_s0, %s671_s20 }
   0x3   :  { %1293 = sst [smem:[#allocation30_spill]] %s1275_s5  ;;  %p675_p1 = scmp.lt.u32.totalorder %s671_s20, %s1270_s0 }
   0x5   :  { %p677_p2 = pnand %p675_p1, %p672_p0 }
   0x7   :  { %680 = shalt.err (!%p677_p2)  }
   0x8   :  { %s911_s25 = smov [#allocation4]  }
   0x9   :  { %11 = dma.hbm_to_smem %s1270_s0, 32, %s911_s25, [#allocation3] }
   0xa   :  { %843 = dma.done.wait [#allocation3], 32 }
   0xb   :  { %844 = vsyncadd [#allocation3], 4294967264 }
   0xc   :  { %13 = sfence }
   0xd   :  { %14 = vsyncpa [#allocation6], 0 }
   0xe   :  { %16 = vsyncpa [#allocation6 + $0x1], 0 }
   0xf   :  { %17 = vsyncpa [#allocation9], 0 }
  0x10   :  { %18 = vsyncpa [#allocation7], 0 }
  0x11   :  { %20 = vsyncpa [#allocation7 + $0x1], 0  ;;  %s964_s28 = smov 0   ;;  %s966_s29 = smov 0  }
  0x12   :  { %s968_s30 = smov 0   ;;  %s970_s6 = smov 0  }
  0x13   :  { %s972_s7 = smov 0   ;;  %s974_s8 = smov 0  }
  0x14   :  { %s976_s0 = smov 0   ;;  %s978_s9 = smov 0  }
  0x15   :  { %s980_s10 = smov 0   ;;  %s982_s11 = smov 0  }
  0x16   :  { %s984_s12 = smov 0  }
  0x17 LB: > { %1294 = sst [smem:[#allocation20_spill]] %s861_s28  ;;  %s487_s13 = sadd.s32 4294967295, %s901_s12   ;;  %s901_s12 = sphi %s984_s12, %s26_s12   ;;  %s897_s11 = sphi %s982_s11, %s1328_s11   ;;  %s893_s10 = sphi %s980_s10, %s1327_s10   ;;  %s889_s9 = sphi %s978_s9, %s1326_s9   ;;  %s885_s0 = sphi %s976_s0, %s1325_s0   ;;  %s881_s8 = sphi %s974_s8, %s1334_s8   ;;  %s877_s7 = sphi %s972_s7, %s1333_s7   ;;  %s873_s6 = sphi %s970_s6, %s1332_s6   ;;  %s869_s30 = sphi %s968_s30, %s1331_s30   ;;  %s865_s29 = sphi %s966_s29, %s1330_s29   ;;  %s861_s28 = sphi %s964_s28, %s1329_s28  }
  0x18   : > { %1295 = sst [smem:[#allocation21_spill]] %s893_s10  ;;  %s488_s14 = sadd.s32 4294967294, %s901_s12  }
  0x19   : > { %1296 = sst [smem:[#allocation22_spill]] %s897_s11  ;;  %p58_p3 = scmp.ne.s32.totalorder %s877_s7, %s873_s6 }
  0x1a   : > { %p1020_p4 = scmp.eq.s32.totalorder %s487_s13, 0  ;;  %p125_p5 = scmp.ne.s32.totalorder %s869_s30, %s865_s29 }
  0x1b   : > { %p126_p6 = scmp.eq.s32.totalorder %s487_s13, 3  ;;  %p131_p8 = scmp.ne.s32.totalorder %s865_s29, %s861_s28 }
  0x1c   : > { %s1297_s15 = scalar_select %p1020_p4, 1, 0 }
  0x1d   : > { %p1028_p7 = por %p1020_p4, %p58_p3  ;;  %p1034_p9 = por %p126_p6, %p125_p5 }
  0x1e   : > { %p132_p10 = scmp.eq.s32.totalorder %s488_s14, 3  ;;  %p489_p11 = scmp.ge.s32.totalorder %s901_s12, 1 }
  0x1f   : > { %s1298_s16 = scalar_select %p1028_p7, 1, 0 }
  0x20   : > { %s1299_s17 = scalar_select %p1034_p9, 1, 0 }
  0x21   : > { %p139_p12 = scmp.lt.s32.totalorder %s901_s12, 5  ;;  %p1040_p13 = por %p132_p10, %p131_p8 }
  0x22   : > { %1300 = sst [smem:[#allocation23_spill]] %s1299_s17  ;;  %s912_s20 = smov [#allocation8]  }
  0x23   : > { %s1301_s18 = scalar_select %p1040_p13, 1, 0 }
  0x24   : > { %p1044_p0 = pnand %p489_p11, %p139_p12  ;;  %s151_s21 = sshll.u32 %s912_s20, 4  ;;  %s152_s21 = int_to_ptr.vmem [resolvable:$true] %s151_s21 }
  0x25   : > { %1302 = sst [smem:[#allocation24_spill]] %s1301_s18  ;;  %s1305_s2 = sld [smem:[#allocation29_spill]] }
  0x26   : > { %s1303_s19 = scalar_select %p1044_p0, 1, 0 }
  0x27   : > { %p542_p1 = pneg %p1044_p0 }
  0x29   : > { %p1052_p2 = pnand %p542_p1, %p1020_p4 }
  0x2b   : > { %s681_s25 = scalar_lea.hbm %s1305_s2, 512  ;;  %p683_p5 = pneg %p1052_p2 }
  0x2c   : > { %p682_p3 = scmp.ne.s32.totalorder %s1305_s2, %s681_s25  ;;  %p688_p10 = scmp.lt.u32.totalorder %s681_s25, %s1305_s2 }
  0x2e   : > { %p684_p6 = pnand %p683_p5, %p682_p3 }
  0x30   : > { %p685_p8 = pneg %p684_p6 }
  0x32   : > { %p690_p11 = pnand %p688_p10, %p685_p8 }
  0x34   : > { %693 = shalt.err (!%p690_p11)
}
  0x35   : > { %s694_s14 = scalar_lea.vmem %s152_s21, 512  ;;  %p702_p9 = scmp.lt.s32.totalorder %s152_s21, %s152_s21 }
  0x36   : > { %p695_p12 = scmp.ne.s32.totalorder %s152_s21, %s694_s14  ;;  %p703_p4 = scmp.lt.s32.totalorder %s694_s14, %s694_s14 }
  0x38   : > { %p697_p1 = pnand %p695_p12, %p683_p5  ;;  %p704_p7 = por %p703_p4, %p702_p9 }
  0x3a   : > { %p698_p13 = pneg %p697_p1 }
  0x3c   : > { %p705_p0 = pnand %p704_p7, %p698_p13 }
  0x3e   : > { %708 = shalt.err (!%p705_p0)
}
  0x3f   : > { %s913_s20 = smov 128   ;;  %s914_s23 = smov 8  }
  0x40   : > { %545 = dma.hbm_to_vmem [thread:$0]  (!%p1052_p2), %s1305_s2, 512, %s152_s21, [#allocation9], %s913_s20, %s913_s20, %s914_s23  }
  0x41   : > { %s35_s26 = sadd.s32 1, %s893_s10  ;;  %s38_s27 = sadd.s32 1, %s897_s11 }
  0x42   : > { %p36_p4 = scmp.ge.s32.totalorder %s35_s26, 2  ;;  %s45_s6 = sadd.s32 1, %s881_s8 }
  0x43   : > { %p52_p7 = scmp.ne.s32.totalorder %s881_s8, %s877_s7  ;;  %p53_p9 = scmp.eq.s32.totalorder %s901_s12, 0 }
  0x44   : > { %s1336_s26 = smov (%p36_p4, %s35_s26), 0  ;;  %s1338_s27 = smov (!%p36_p4, %s38_s27), %s897_s11 }
  0x45   : > { %1306 = sst [smem:[#allocation25_spill]] %s1336_s26  ;;  %p1081_p13 = por %p53_p9, %p52_p7 }
  0x46   : > { %s111_s13 = ssub.s32 %s893_s10, %s1336_s26  ;;  %p40_p0 = scmp.ge.s32.totalorder %s1338_s27, 2 }
  0x47   : > { %s115_s21 = sadd.s32 1, %s869_s30  ;;  %p555_p2 = scmp.lt.s32.totalorder %s901_s12, 4 }
  0x48   : > { %s168_s14 = sand.u32 1, %s881_s8   ;;  %s1340_s27 = smov (%p40_p0, %s1338_s27), 0 }
  0x49   : > { %1308 = sst [smem:[#allocation26_spill]] %s1340_s27  ;;  %s492_s20 = sshll.u32 %s168_s14, 3 }
  0x4a   : > { %s42_s23 = ssub.s32 %s897_s11, %s1340_s27  ;;  %s493_s25 = sshll.u32 %s897_s11, 7 }
  0x4b   : > { %p43_p3 = scmp.eq.s32.totalorder %s42_s23, 0  ;;  %s112_s24 = sor.u32 %s111_s13, %s42_s23 }
  0x4c   : > { %p113_p5 = scmp.eq.s32.totalorder %s112_s24, 0  ;;  %s1310_s1 = sld [smem:[#allocation28_spill]] }
  0x4d   : > { %s1096_s2 = scalar_select %p43_p3, %s881_s8, %s45_s6  }
  0x4e   : > { %s1099_s18 = scalar_select %p113_p5, %s869_s30, %s115_s21  }
  0x4f   : > { %1309 = sst [smem:[#allocation27_spill]] %s1096_s2  ;;  %s172_s5 = scalar_lea.vmem [#allocation5], %s492_s20 }
  0x50   : > { %s179_s17 = sshll.u32 %s172_s5, 4  ;;  %p1112_p6 = pnand %p555_p2, %p1081_p13  ;;  %s1106_s17 = int_to_ptr.vmem [resolvable:$true] %s179_s17 }
  0x51   : > { %s169_s13 = scalar_lea.sflag [#allocation6], %s168_s14 }
  0x52   : > { %s1104_s28 = scalar_lea.hbm %s1310_s1, %s493_s25  ;;  %p711_p10 = pneg %p1112_p6 }
  0x53   : > { %s709_s10 = scalar_lea.hbm %s1104_s28, 128  ;;  %s714_s22 = scalar_lea.hbm %s1310_s1, 256 }
  0x54   : > { %p710_p8 = scmp.ne.s32.totalorder %s1104_s28, %s709_s10  ;;  %p715_p1 = scmp.lt.u32.totalorder %s1104_s28, %s1310_s1 }
  0x55   : > { %p716_p4 = scmp.lt.u32.totalorder %s714_s22, %s709_s10  ;;  %p718_p9 = scmp.lt.u32.totalorder %s709_s10, %s1104_s28 }
  0x56   : > { %p712_p11 = pnand %p711_p10, %p710_p8 }
  0x57   : > { %p717_p7 = por %p716_p4, %p715_p1 }
  0x58   : > { %p713_p12 = pneg %p712_p11 }
  0x59   : > { %p719_p13 = por %p718_p9, %p717_p7 }
  0x5b   : > { %p720_p0 = pnand %p719_p13, %p713_p12 }
  0x5d   : > { %723 = shalt.err (!%p720_p0)
}
  0x5e   : > { %s724_s14 = scalar_lea.vmem %s1106_s17, 128  ;;  %s915_s23 = smov [#allocation5]  }
  0x5f   : > { %p725_p2 = scmp.ne.s32.totalorder %s1106_s17, %s724_s14  ;;  %s729_s24 = sshll.u32 %s915_s23, 4  ;;  %s730_s24 = int_to_ptr.vmem [resolvable:$false] %s729_s24 }
  0x60   : > { %s731_s25 = scalar_lea.vmem %s730_s24, 256  ;;  %p732_p8 = scmp.lt.s32.totalorder %s1106_s17, %s730_s24 }
  0x61   : > { %p727_p3 = pnand %p725_p2, %p711_p10  ;;  %p733_p11 = scmp.lt.s32.totalorder %s731_s25, %s724_s14 }
  0x63   : > { %p728_p5 = pneg %p727_p3  ;;  %p734_p1 = por %p733_p11, %p732_p8 }
  0x65   : > { %p735_p4 = pnand %p734_p1, %p728_p5 }
  0x67   : > { %738 = shalt.err (!%p735_p4)
}
  0x68   : > { %549 = dma.hbm_to_vmem [thread:$0]  (!%p1112_p6), %s1104_s28, 128, %s1106_s17, %s169_s13  }
  0x69   : > { %p1312_p12 = scmp.ne.s32.totalorder %s1303_s19, 0 }
  0x6a   : > { %s190_s10 = sand.u32 (!%p1312_p12), 1, %s877_s7   ;;  %p1313_p10 = scmp.ne.s32.totalorder (!%p1312_p12), %s1298_s16, 0 }
  0x6b   : > { %188 = sbr.rel (%p1312_p12) target bundleno = 434 (0x1b2), region = 32  ;;  %s1144_s5 = sshll.u32 (!%p1312_p12), %s190_s10, 3 }
  0x6c   : > { %s191_s26 = scalar_lea.sflag (!%p1312_p12), [#allocation6], %s190_s10 }
  0x72   : > { %846 = dma.done.wait (%p1313_p10), %s191_s26, 128  }
  0x73   : > { %848 = vsyncadd (%p1313_p10), %s191_s26, 4294967168  ;;  %p1314_p7 = scmp.ne.s32.totalorder %s1297_s15, 0 }
  0x75   : > { %850 = dma.done.wait (%p1314_p7), [#allocation9], 512  }
  0x76   : > { %852 = vsyncadd (%p1314_p7), [#allocation9], 4294966784  ;;  %s1288_s28 = sand.u32 1, %s865_s29   ;;  %s1161_s13 = smov 0  }
  0x77   : > { %s497_s19 = sshll.u32 %s1288_s28, 5 }
  0x78   : > { %s1159_s6 = scalar_lea.vmem [#allocation10], %s497_s19 }
  0x79 LB: >> { %s1315_s17 = sshll.u32 %s885_s0, 5  ;;  %s243_s25 = scalar_lea.vmem %s1159_s6, %s905_s13 [#allocation10]  ;;  %s905_s13 = sphi %s1161_s13, %s228_s13  }
  0x7a   : >> { %s229_s15 = sadd.s32 %s905_s13, %s1315_s17  ;;  %s251_s26 = sshll.u32 %s243_s25, 4  ;;  %s252_s26 = int_to_ptr.vmem [resolvable:$true] %s251_s26 }
  0x7b   : >> { %s499_s16 = sadd.s32 4294967288, %s229_s15  ;;  %s741_s11 = scalar_lea.hbm %s1274_s4, 1664 }
  0x7c   : >> { %p231_p6 = scmp.gt.s32.totalorder %s499_s16, 0 }
  0x7e   : >> { %s1342_s16 = smov (!%p231_p6, %s499_s16), 0 }
  0x7f   : >> { %s233_s21 = sshra.s32 %s1342_s16, 7  ;;  %s238_s20 = sand.u32 127, %s1342_s16 }
  0x80   : >> { %s235_s14 = sadd.s32 %s889_s9, %s233_s21 }
  0x81   : >> { %s500_s23 = sshll.u32 %s235_s14, 7 }
  0x82   : >> { %s239_s24 = sadd.s32 %s500_s23, %s238_s20 }
  0x83   : >> { %s240_s10 = sld [smem:[#allocation4 + %s239_s24]] }
  0x89   : >> { %s501_s19 = sshll.u32 %s240_s10, 4 }
  0x8a   : >> { %s242_s1 = scalar_lea.hbm %s1274_s4, %s501_s19 }
  0x8b   : >> { %s739_s27 = scalar_lea.hbm %s242_s1, 16  ;;  %p742_p13 = scmp.lt.u32.totalorder %s242_s1, %s1274_s4 }
  0x8c   : >> { %p740_p9 = scmp.ne.s32.totalorder %s242_s1, %s739_s27  ;;  %p743_p0 = scmp.lt.u32.totalorder %s741_s11, %s739_s27 }
  0x8d   : >> { %p745_p3 = scmp.lt.u32.totalorder %s739_s27, %s242_s1 }
  0x8e   : >> { %p744_p2 = por %p743_p0, %p742_p13 }
  0x90   : >> { %p746_p5 = por %p745_p3, %p744_p2 }
  0x92   : >> { %p747_p8 = pnand %p746_p5, %p740_p9 }
  0x94   : >> { %750 = shalt.err (!%p747_p8)  }
  0x95   : >> { %s751_s21 = scalar_lea.vmem %s252_s26, 16  ;;  %s916_s22 = smov [#allocation10]  }
  0x96   : >> { %p752_p11 = scmp.ne.s32.totalorder %s252_s26, %s751_s21  ;;  %s753_s28 = sshll.u32 %s916_s22, 4  ;;  %s1181_s28 = int_to_ptr.vmem [resolvable:$false] %s753_s28 }
  0x97   : >> { %s755_s17 = scalar_lea.vmem %s1181_s28, 1024  ;;  %p756_p1 = scmp.lt.s32.totalorder %s252_s26, %s1181_s28 }
  0x98   : >> { %p757_p4 = scmp.lt.s32.totalorder %s755_s17, %s751_s21 }
  0x9a   : >> { %p758_p12 = por %p757_p4, %p756_p1 }
  0x9c   : >> { %p759_p10 = pnand %p758_p12, %p752_p11 }
  0x9e   : >> { %762 = shalt.err (!%p759_p10)  }
  0x9f   : >> { %254 = dma.hbm_to_vmem [thread:$0]  %s242_s1, 16, %s252_s26, [#allocation2] }
  0xa0   : >> { %s228_s13 = sadd.s32 1, %s905_s13  }
  0xa1   : >> { %p225_p7 = scmp.ge.s32.totalorder %s228_s13, 32  }
  0xa2   : > { %s907_s2 = smov (%p225_p7), 0  }
  0xa3   : > { %227 = sbr.rel (!%p225_p7) target bundleno = 121 (0x79), region = 105 }
  0xaa LB: >> { %853 = dma.done.wait [#allocation2], 16  ;;  %s909_s2 = sphi %s907_s2, %s260_s2  }
  0xab   : >> { %854 = vsyncadd [#allocation2], 4294967280  ;;  %s260_s2 = sadd.s32 1, %s909_s2  }
  0xac   : >> { %p257_p6 = scmp.ge.s32.totalorder %s260_s2, 32  }
  0xad   : > { %p502_p9 = scmp.ne.s32.totalorder (%p257_p6), %s885_s0, 0 }
  0xae   : > { %259 = sbr.rel (!%p257_p6) target bundleno = 170 (0xaa), region = 116 }
  0xb5   : > { %267 = sbr.rel (%p502_p9) target bundleno = 406 (0x196), region = 62  ;;  %v269_v0 = vld [vmem:[#allocation8] sm:$0xff] (!%p502_p9)  ;;  %v270_v1 = vld [vmem:[#allocation8 + $0x8] sm:$0xff] (!%p502_p9)  ;;  %v271_v2 = vld [vmem:[#allocation8 + $0x10] sm:$0xff] (!%p502_p9)  ;;  %v917_v3 = vmov (!%p502_p9), 0.0|0.0   ;;  %vm918_vm0 = vmmov (!%p502_p9), 0  }
  0xb6   : > { %528 = vmatprep.subr.bf16.mxu0 (!%p502_p9), %v917_v3  ;;  %v529_v4 = vpack.c.bf16 (!%p502_p9), %v270_v1, %v269_v0  ;;  %v272_v5 = vld [vmem:[#allocation8 + $0x18] sm:$0xff] (!%p502_p9)  ;;  %v919_v6 = vmov (!%p502_p9), 0.0   ;;  %s1316_s1 = scalar_lea.vmem (!%p502_p9), [#allocation5], %s1144_s5  ;;  %vm280_vm1 = vcmask (!%p502_p9), 261120   ;;  %v503_v9 = vld [vmem:[%s1273_s3] ss:$0 sm:$0xff] (!%p502_p9) }
  0xb7   : > { %525 = vmatprep.mubr.msk.f32.mxu0 (!%p502_p9), %vm918_vm0, %v919_v6  ;;  %v532_v7 = vpack.c.bf16 (!%p502_p9), %v272_v5, %v271_v2  ;;  %v268_v8 = vld [vmem:[%s1316_s1] sm:$0xff] (!%p502_p9) }
  0xb8   : > { %530 = vmatpush3.bf16.msra.mxu0 (!%p502_p9), %v529_v4 }
  0xb9   : > { %531 = vmatprep.subr.bf16.mxu0 (!%p502_p9), %v917_v3 }
  0xbc   : > { %533 = vmatpush3.bf16.msra.mxu0 %v532_v7 }
  0xbf   : > { %526 = vmatmul.mubr.msk.f32.vlgmr.msra.gmra.mrb[0].mxu0 %vm280_vm1, %v268_v8 }
 0x192   : > { %v350_v10 = vpop.f32.mrb[0].mxu0 }
 0x193   : > { %v351_v11 = vadd.f32 %v503_v9, %v350_v10  ;;  %v527_v12 = vpop.f32.mrb[1].mxu0 }
 0x195   : > { %354 = vst [vmem:[%s1159_s6] sm:$0xff] %v351_v11 }
 0x196 PF: > { %s1317_s13 = sld [smem:[#allocation23_spill]]  ;;  %s506_s5 = sshll.u32 %s885_s0, 2 }
 0x197   : > { %s507_s20 = sshll.u32 %s889_s9, 3  ;;  %s371_s14 = sshll.u32 %s1159_s6, 4  ;;  %s1200_s14 = int_to_ptr.vmem [resolvable:$true] %s371_s14 }
 0x198   : > { %s368_s23 = sadd.s32 %s507_s20, %s506_s5  ;;  %s1318_s26 = sld [smem:[#allocation30_spill]] }
 0x199   : > { %s508_s24 = sshll.u32 %s368_s23, 7  ;;  %s1319_s15 = sand.u32 1, %s865_s29  }
 0x19a   : > { %s356_s16 = scalar_lea.sflag [#allocation7], %s1319_s15  ;;  %s763_s21 = scalar_lea.vmem %s1200_s14, 512 }
 0x19b   : > { %p764_p13 = scmp.ne.s32.totalorder %s1200_s14, %s763_s21  ;;  %p770_p5 = scmp.lt.s32.totalorder %s1200_s14, %s1181_s28 }
 0x19c   : > { %p1320_p0 = scmp.ne.s32.totalorder %s1317_s13, 0  ;;  %p771_p8 = scmp.lt.s32.totalorder %s755_s17, %s763_s21 }
 0x19e   : > { %s1205_s19 = scalar_lea.hbm %s1318_s26, %s508_s24  ;;  %p765_p2 = pnand %p764_p13, %p1320_p0 }
 0x19f   : > { %p772_p11 = por %p771_p8, %p770_p5 }
 0x1a0   : > { %p766_p3 = pneg %p765_p2 }
 0x1a2   : > { %p773_p1 = pnand %p772_p11, %p766_p3 }
 0x1a4   : > { %776 = shalt.err (!%p773_p1)
}
 0x1a5   : > { %s777_s0 = scalar_lea.hbm %s1205_s19, 512  ;;  %s781_s22 = scalar_lea.hbm %s1318_s26, 2048 }
 0x1a6   : > { %p778_p4 = scmp.ne.s32.totalorder %s1205_s19, %s777_s0  ;;  %p782_p7 = scmp.lt.u32.totalorder %s1205_s19, %s1318_s26 }
 0x1a7   : > { %p783_p6 = scmp.lt.u32.totalorder %s781_s22, %s777_s0  ;;  %p785_p13 = scmp.lt.u32.totalorder %s777_s0, %s1205_s19 }
 0x1a8   : > { %p779_p12 = pnand %p778_p4, %p1320_p0 }
 0x1a9   : > { %p784_p9 = por %p783_p6, %p782_p7 }
 0x1aa   : > { %p780_p10 = pneg %p779_p12 }
 0x1ab   : > { %p786_p2 = por %p785_p13, %p784_p9 }
 0x1ad   : > { %p787_p3 = pnand %p786_p2, %p780_p10 }
 0x1af   : > { %790 = shalt.err (!%p787_p3)
}
 0x1b0   : > { %s920_s17 = smov 128   ;;  %s921_s1 = smov 8  }
 0x1b1   : > { %540 = dma.vmem_to_hbm [thread:$0]  (%p1320_p0), %s1200_s14, 512, %s1205_s19, %s356_s16, %s920_s17, %s920_s17, %s921_s1  }
 0x1b2 PF: > { %s1321_s11 = sld [smem:[#allocation20_spill]]  ;;  %s1322_s27 = sld [smem:[#allocation24_spill]] }
 0x1b3   : > { %p557_p5 = scmp.ge.s32.totalorder %s901_s12, 2 }
 0x1b8   : > { %s386_s5 = sand.u32 1, %s1321_s11   ;;  %p1323_p8 = scmp.ne.s32.totalorder %s1322_s27, 0 }
 0x1b9   : > { %s387_s20 = scalar_lea.sflag [#allocation7], %s386_s5 }
 0x1ba   : > { %p551_p11 = pnand %p557_p5, %p1323_p8 }
 0x1bc   : > { %856 = dma.done.wait (!%p551_p11), %s387_s20, 512  }
 0x1bd   : > { %858 = vsyncadd (!%p551_p11), %s387_s20, 4294966784  ;;  %s26_s12 = sadd.s32 1, %s901_s12   ;;  %s1324_s13 = sld [smem:[#allocation27_spill]] }
 0x1be   : > { %p23_p1 = scmp.ge.s32.totalorder %s26_s12, 6   ;;  %s1325_s0 = sld [smem:[#allocation21_spill]] }
 0x1bf   : > { %s1326_s9 = sld [smem:[#allocation22_spill]]  ;;  %s1327_s10 = sld [smem:[#allocation25_spill]] }
 0x1c0   : > { %s1328_s11 = sld [smem:[#allocation26_spill]]  ;;  %s1329_s28 = smov %s865_s29 }
 0x1c1   : > { %s1330_s29 = smov %s869_s30  ;;  %s1331_s30 = smov %s1099_s18 }
 0x1c2   : > { %s1332_s6 = smov %s877_s7  ;;  %s1333_s7 = smov %s881_s8 }
 0x1c3   : > { %s1334_s8 = smov %s1324_s13  ;;  %25 = sbr.rel (!%p23_p1) target bundleno = 23 (0x17), region = 127 }
 0x1ca   :  { %392 = vsyncpa [#allocation6], 1 }
 0x1cb   :  { %394 = vsyncpa [#allocation6 + $0x1], 1 }
 0x1cc   :  { %395 = vsyncpa [#allocation9], 1 }
 0x1cd   :  { %396 = vsyncpa [#allocation7], 1 }
 0x1ce   :  { %398 = vsyncpa [#allocation7 + $0x1], 1 }
 0x1cf   :  { %399 = vsyncmov [#allocation2] }
 0x1d2   :  { %s400_s18 = vpop.sfrf %399 }
 0x1d3   :  { %p511_p0 = scmp.ne.s32.totalorder %s400_s18, 0 }
 0x1d5   :  { %404 = shalt.err (%p511_p0)  }

</bundles_post_ra>
